<compile_context>
chip_gen: v5e
topology: v5e:2x2
jax: 0.10.0
libtpu: 0.0.40
codegen_flags: <defaults>
</compile_context>

<pallas_src>
import functools

import jax
import jax.numpy as jnp
from jax.experimental import pallas as pl
from jax.experimental.pallas import tpu as pltpu

_VMEM_BUDGET = 24 << 20   # per-step working set; safe under v7x's 32 MiB scoped default


def _var_dist_kernel(basis_ref, x_ref, w_ref, b_ref, *refs,
                     window_size, t_len, halo, emit_conv):
    """One batch block per grid step; (batch, time) on lanes, neurons on rows.

    basis_ref : SMEM (W,) f32            temporal basis
    x_ref     : VMEM (Nv, Bb*T_pad) bf16 visible spikes, lane = b*T_pad + t
    w_ref     : VMEM (Nh, Nv) f32        visible -> hidden weight (transposed)
    b_ref     : VMEM (Nh, 1)  f32        hidden bias
    conv_ref  : VMEM (Nv, Bb*T_pad)      convolved visible spikes (if emit_conv)
    rate_ref  : VMEM (Nh, Bb*T_pad)      hidden-neuron Poisson rates
    pad_ref   : VMEM (Nv, halo+Bb*T_pad) bf16 staging buffer with left halo
    """
    if emit_conv:
        conv_ref, rate_ref, pad_ref = refs
    else:
        rate_ref, pad_ref = refs
    nv, lanes = x_ref.shape

    # Stage the spike block behind a `halo`-lane gutter so every lag tau is a
    # single static lane-shifted slice (aligned store + shifted loads; no roll,
    # no concat).  The gutter is zeroed for hygiene only; its contents are
    # never selected because of the t < tau mask below.
    pad_ref[:, :halo] = jnp.zeros((nv, halo), jnp.bfloat16)
    pad_ref[:, halo:halo + lanes] = x_ref[...]

    # Time index within each batch's T_pad-long lane segment.  Masks the
    # t < tau pre-history terms and any cross-batch leakage when several
    # batches share the lane axis of one block.  A few VPU ops on idle slots.
    lane = jax.lax.broadcasted_iota(jnp.int32, (nv, lanes), 1)
    if t_len & (t_len - 1) == 0:            # T_pad is a power of two here
        t_in_seg = lane & (t_len - 1)
    else:
        t_in_seg = lane % t_len

    # Causal convolution:
    #   conv[:, b*T + t] = sum_{tau=1..W} basis[tau-1] * spikes[:, b*T + t - tau]
    # W is tiny -> fully unrolled; the f32 upcast is per-lag (no persistent
    # f32 copy of the input slab).
    conv = None
    for tau in range(1, window_size + 1):
        start = halo - tau
        shifted = pad_ref[:, start:start + lanes].astype(jnp.float32)
        term = basis_ref[tau - 1] * jnp.where(t_in_seg >= tau, shifted, 0.0)
        conv = term if conv is None else conv + term

    if emit_conv:
        conv_ref[...] = conv.astype(conv_ref.dtype)      # full-lane store

    # Hidden-neuron rates: one 2-D MXU matmul contracting only over Nv, then
    # the Poisson inverse link (softplus -> EUP slot).
    pre = jnp.dot(w_ref[...], conv, preferred_element_type=jnp.float32) + b_ref[...]
    # TODO(synk): on v6e/v7x a bf16 softplus would double EUP throughput if the
    # transcendental slot ever binds; kept in f32 so the same kernel is v5e-safe.
    rate_ref[...] = jax.nn.softplus(pre).astype(rate_ref.dtype)


def _pick_batch_block(batch, db_bytes_per_batch, sb_bytes_per_batch, fixed_bytes,
                      budget=_VMEM_BUDGET):
    """Largest divisor of `batch` whose per-step VMEM fits the budget, preferring
    >= 4 grid steps (v7x: 2 TensorCores x >= 2 pipelined steps each), then >= 2."""
    divisors = [d for d in range(1, batch + 1) if batch % d == 0]

    def need(d):   # in/out blocks are double-buffered by the pipeline; scratch is not
        return 2 * d * db_bytes_per_batch + d * sb_bytes_per_batch + fixed_bytes

    feasible = [d for d in divisors if need(d) <= budget] or [1]
    for min_steps in (4, 2, 1):
        cands = [d for d in feasible if batch // d >= min_steps]
        if cands:
            return max(cands)
    return 1


def variational_forward(vis_spikes, basis, weight, bias, *,
                        out_dtype=jnp.bfloat16, emit_conv=True, batch_block=None):
    """Fused forward hot path of VariationalDistribution subclasses.

    vis_spikes: [B, T, Nv] binary spikes, basis: [W], weight: [Nv, Nh], bias: [Nh].

    Returns (convolved_vis_spikes, hidden_rates) in the lane-dense neuron-major
    layout (Nv, B*T_pad) / (Nh, B*T_pad) with lane index = b*T_pad + t and
    T_pad = T rounded up to a multiple of 128, so no output transpose is paid;
    use to_time_major() to recover the module's [B, T, N] convention.
    convolved_vis_spikes is None when emit_conv=False (v5e writeback saver).
    """
    B, T, Nv = vis_spikes.shape
    W = int(basis.shape[0])
    Nh = int(weight.shape[1])

    T_pad = ((T + 127) // 128) * 128            # lane-aligned batch segments
    halo = max(128, ((W + 127) // 128) * 128)   # staging gutter (>= W, aligned)

    # One input transpose to the neuron-major layout (the smallest tensor; the
    # bf16 cast is exact for binary spikes and halves its HBM traffic).
    x = jnp.transpose(vis_spikes.astype(jnp.bfloat16), (2, 0, 1))   # (Nv, B, T)
    if T_pad != T:
        x = jnp.pad(x, ((0, 0), (0, 0), (0, T_pad - T)))
    x = x.reshape(Nv, B * T_pad)

    wt = weight.T.astype(jnp.float32)                               # (Nh, Nv)
    b_col = bias.astype(jnp.float32).reshape(Nh, 1)
    basis = basis.astype(jnp.float32)

    osize = jnp.dtype(out_dtype).itemsize
    db_per_batch = T_pad * (Nv * 2 + (Nv * osize if emit_conv else 0) + Nh * osize)
    sb_per_batch = Nv * T_pad * 2                                   # staging scratch
    fixed = Nv * halo * 2 + Nh * Nv * 4 + Nh * 4 + 4 * W + (1 << 16)

    if batch_block is None:
        batch_block = _pick_batch_block(B, db_per_batch, sb_per_batch, fixed)
    Bb = int(batch_block)
    assert B % Bb == 0, "batch_block must divide the batch size"
    n_blocks = B // Bb
    lanes = Bb * T_pad

    vmem_need = 2 * Bb * db_per_batch + Bb * sb_per_batch + fixed
    vmem_limit = int(min(max(vmem_need + (8 << 20), 32 << 20), 48 << 20))

    kernel = functools.partial(_var_dist_kernel, window_size=W, t_len=T_pad,
                               halo=halo, emit_conv=emit_conv)

    out_shape, out_specs = [], []
    if emit_conv:
        out_shape.append(jax.ShapeDtypeStruct((Nv, B * T_pad), out_dtype))
        out_specs.append(pl.BlockSpec((Nv, lanes), lambda i: (0, i)))
    out_shape.append(jax.ShapeDtypeStruct((Nh, B * T_pad), out_dtype))
    out_specs.append(pl.BlockSpec((Nh, lanes), lambda i: (0, i)))

    outs = pl.pallas_call(
        kernel,
        out_shape=tuple(out_shape),
        grid_spec=pltpu.PrefetchScalarGridSpec(
            num_scalar_prefetch=0,
            grid=(n_blocks,),
            in_specs=[
                pl.BlockSpec(memory_space=pltpu.MemorySpace.SMEM),    # basis
                pl.BlockSpec((Nv, lanes), lambda i: (0, i)),          # spikes
                pl.BlockSpec((Nh, Nv), lambda i: (0, 0)),             # weight^T
                pl.BlockSpec((Nh, 1), lambda i: (0, 0)),              # bias
            ],
            out_specs=out_specs,
            scratch_shapes=[pltpu.VMEM((Nv, halo + lanes), jnp.bfloat16)],
        ),
        compiler_params=pltpu.CompilerParams(
            dimension_semantics=("parallel",),
            vmem_limit_bytes=vmem_limit),
    )(basis, x, wt, b_col)

    if emit_conv:
        conv_nm, rate_nm = outs
    else:
        conv_nm = None
        rate_nm = outs[0] if isinstance(outs, (tuple, list)) else outs
    return conv_nm, rate_nm


def to_time_major(y_nm, batch, t_len):
    """(N, B*T_pad) neuron-major kernel output -> [B, T, N] module convention.

    Test/compat plumbing only; downstream consumers should use the
    neuron-major layout directly to avoid this extra HBM round trip.
    """
    n = y_nm.shape[0]
    t_pad = y_nm.shape[1] // batch
    return jnp.transpose(y_nm.reshape(n, batch, t_pad)[:, :, :t_len], (1, 2, 0))


def _reference(vis_spikes, basis, weight, bias):
    B, T, Nv = vis_spikes.shape
    W = basis.shape[0]
    padded = jnp.concatenate(
        [jnp.zeros((B, W, Nv), vis_spikes.dtype), vis_spikes], axis=1)
    conv = jnp.zeros((B, T, Nv), jnp.float32)
    for tau in range(1, W + 1):
        start = W - tau
        conv = conv + basis[tau - 1] * padded[:, start:start + T, :]
    rates = jax.nn.softplus(jnp.einsum("btv,vh->bth", conv, weight) + bias)
    return conv, rates


if __name__ == "__main__":
    # Module hyperparameters (small, consistent with the __init__ signature).
    n_neurons = 8
    n_vis_neurons = 4
    n_hid_neurons = n_neurons - n_vis_neurons
    window_size = 3
    B, T = 4, 128                      # T on lanes -> full 128-wide vregs

    key = jax.random.PRNGKey(0)
    k_spk, k_w, k_b = jax.random.split(key, 3)

    basis = jnp.exp(-jnp.arange(window_size, dtype=jnp.float32) / 2.0)
    weight = 0.1 * jax.random.normal(k_w, (n_vis_neurons, n_hid_neurons),
                                     dtype=jnp.float32)
    bias = 0.05 * jax.random.normal(k_b, (n_hid_neurons,), dtype=jnp.float32)
    vis_spikes = jax.random.bernoulli(
        k_spk, p=0.3, shape=(B, T, n_vis_neurons)).astype(jnp.float32)

    conv_expect, rate_expect = _reference(vis_spikes, basis, weight, bias)

    # Run A: f32 outputs, 2 batches per block (exercises the cross-batch mask).
    conv_a, rate_a = variational_forward(vis_spikes, basis, weight, bias,
                                         out_dtype=jnp.float32, batch_block=2)
    jax.block_until_ready((conv_a, rate_a))
    assert jnp.allclose(to_time_major(conv_a, B, T), conv_expect, atol=1e-5), \
        "f32 convolution mismatch"
    assert jnp.allclose(to_time_major(rate_a, B, T), rate_expect, atol=1e-2), \
        "f32 rate mismatch"

    # Run B: default bf16 outputs (halved writeback), auto batch block
    # (-> 4 parallel grid steps).
    conv_b, rate_b = variational_forward(vis_spikes, basis, weight, bias)
    jax.block_until_ready((conv_b, rate_b))
    assert jnp.allclose(to_time_major(conv_b, B, T).astype(jnp.float32),
                        conv_expect, atol=2.5e-2), "bf16 convolution mismatch"
    assert jnp.allclose(to_time_major(rate_b, B, T).astype(jnp.float32),
                        rate_expect, atol=2.5e-2), "bf16 rate mismatch"

    # Run C: rates only (v5e-oriented variant skipping the conv writeback).
    _, rate_c = variational_forward(vis_spikes, basis, weight, bias,
                                    emit_conv=False, batch_block=4)
    jax.block_until_ready(rate_c)
    assert jnp.allclose(to_time_major(rate_c, B, T).astype(jnp.float32),
                        rate_expect, atol=2.5e-2), "rates-only mismatch"

    print("KERNEL_OK")
</pallas_src>

<mosaic_0001>
module attributes {stable_mosaic.version = 11 : i64} {
  func.func @_var_dist_kernel(%arg0: i32, %arg1: memref<3xf32, #tpu.memory_space<smem>>, %arg2: memref<4x256xbf16, #tpu.memory_space<vmem>>, %arg3: memref<4x4xf32, #tpu.memory_space<vmem>>, %arg4: memref<4x1xf32, #tpu.memory_space<vmem>>, %arg5: memref<4x256xf32, #tpu.memory_space<vmem>>, %arg6: memref<4x256xf32, #tpu.memory_space<vmem>>, %arg7: memref<4x384xbf16, #tpu.memory_space<vmem>>) attributes {dimension_semantics = [#tpu.dimension_semantics<parallel>], iteration_bounds = array<i64: 2>, scalar_prefetch = 0 : i64, scratch_operands = 1 : i64, tpu.core_type = #tpu.core_type<tc>, window_params = [{transform_indices = @transform_0, window_bounds = array<i64: 3>}, {transform_indices = @transform_1, window_bounds = array<i64: 4, 256>}, {pipeline_mode = #tpu.pipeline_mode<synchronous>, transform_indices = @transform_2, window_bounds = array<i64: 4, 4>}, {pipeline_mode = #tpu.pipeline_mode<synchronous>, transform_indices = @transform_3, window_bounds = array<i64: 4, 1>}, {transform_indices = @transform_4, window_bounds = array<i64: 4, 256>}, {transform_indices = @transform_5, window_bounds = array<i64: 4, 256>}]} {
    %cst = arith.constant 0.000000e+00 : bf16
    %0 = vector.broadcast %cst : bf16 to vector<4x128xbf16>
    %c0 = arith.constant 0 : index
    %c0_0 = arith.constant 0 : index
    %1 = vector.load %arg7[%c0, %c0_0] : memref<4x384xbf16, #tpu.memory_space<vmem>>, vector<4x128xbf16>
    tpu.vector_store %arg7[%c0, %c0_0], %0 {strides = array<i32>} : memref<4x384xbf16, #tpu.memory_space<vmem>>, vector<4x128xbf16>,
    %c0_1 = arith.constant 0 : index
    %c0_2 = arith.constant 0 : index
    %2 = vector.load %arg2[%c0_1, %c0_2] : memref<4x256xbf16, #tpu.memory_space<vmem>>, vector<4x256xbf16>
    %c0_3 = arith.constant 0 : index
    %c128 = arith.constant 128 : index
    %3 = vector.load %arg7[%c0_3, %c128] : memref<4x384xbf16, #tpu.memory_space<vmem>>, vector<4x256xbf16>
    tpu.vector_store %arg7[%c0_3, %c128], %2 {strides = array<i32>} : memref<4x384xbf16, #tpu.memory_space<vmem>>, vector<4x256xbf16>,
    %4 = tpu.iota {dimensions = array<i32: 1>} : vector<4x256xi32>
    %c127_i32 = arith.constant 127 : i32
    %5 = vector.broadcast %c127_i32 : i32 to vector<4x256xi32>
    %6 = arith.andi %4, %5 : vector<4x256xi32>
    %c0_4 = arith.constant 0 : index
    %c127 = arith.constant 127 : index
    %7 = vector.load %arg7[%c0_4, %c127] : memref<4x384xbf16, #tpu.memory_space<vmem>>, vector<4x256xbf16>
    %8 = arith.extf %7 : vector<4x256xbf16> to vector<4x256xf32>
    %c0_5 = arith.constant 0 : index
    %9 = memref.load %arg1[%c0_5] : memref<3xf32, #tpu.memory_space<smem>>
    %c1_i32 = arith.constant 1 : i32
    %10 = vector.broadcast %c1_i32 : i32 to vector<4x256xi32>
    %11 = arith.cmpi sge, %6, %10 : vector<4x256xi32>
    %cst_6 = arith.constant 0.000000e+00 : f32
    %12 = vector.broadcast %cst_6 : f32 to vector<4x256xf32>
    %13 = arith.select %11, %8, %12 : vector<4x256xi1>, vector<4x256xf32>
    %14 = vector.broadcast %9 : f32 to vector<4x256xf32>
    %15 = arith.mulf %14, %13 : vector<4x256xf32>
    %c0_7 = arith.constant 0 : index
    %c126 = arith.constant 126 : index
    %16 = vector.load %arg7[%c0_7, %c126] : memref<4x384xbf16, #tpu.memory_space<vmem>>, vector<4x256xbf16>
    %17 = arith.extf %16 : vector<4x256xbf16> to vector<4x256xf32>
    %c1 = arith.constant 1 : index
    %18 = memref.load %arg1[%c1] : memref<3xf32, #tpu.memory_space<smem>>
    %c2_i32 = arith.constant 2 : i32
    %19 = vector.broadcast %c2_i32 : i32 to vector<4x256xi32>
    %20 = arith.cmpi sge, %6, %19 : vector<4x256xi32>
    %cst_8 = arith.constant 0.000000e+00 : f32
    %21 = vector.broadcast %cst_8 : f32 to vector<4x256xf32>
    %22 = arith.select %20, %17, %21 : vector<4x256xi1>, vector<4x256xf32>
    %23 = vector.broadcast %18 : f32 to vector<4x256xf32>
    %24 = arith.mulf %23, %22 : vector<4x256xf32>
    %25 = arith.addf %15, %24 : vector<4x256xf32>
    %c0_9 = arith.constant 0 : index
    %c125 = arith.constant 125 : index
    %26 = vector.load %arg7[%c0_9, %c125] : memref<4x384xbf16, #tpu.memory_space<vmem>>, vector<4x256xbf16>
    %27 = arith.extf %26 : vector<4x256xbf16> to vector<4x256xf32>
    %c2 = arith.constant 2 : index
    %28 = memref.load %arg1[%c2] : memref<3xf32, #tpu.memory_space<smem>>
    %c3_i32 = arith.constant 3 : i32
    %29 = vector.broadcast %c3_i32 : i32 to vector<4x256xi32>
    %30 = arith.cmpi sge, %6, %29 : vector<4x256xi32>
    %cst_10 = arith.constant 0.000000e+00 : f32
    %31 = vector.broadcast %cst_10 : f32 to vector<4x256xf32>
    %32 = arith.select %30, %27, %31 : vector<4x256xi1>, vector<4x256xf32>
    %33 = vector.broadcast %28 : f32 to vector<4x256xf32>
    %34 = arith.mulf %33, %32 : vector<4x256xf32>
    %35 = arith.addf %25, %34 : vector<4x256xf32>
    %c0_11 = arith.constant 0 : index
    %c0_12 = arith.constant 0 : index
    %36 = vector.load %arg5[%c0_11, %c0_12] : memref<4x256xf32, #tpu.memory_space<vmem>>, vector<4x256xf32>
    tpu.vector_store %arg5[%c0_11, %c0_12], %35 {strides = array<i32>} : memref<4x256xf32, #tpu.memory_space<vmem>>, vector<4x256xf32>,
    %c0_13 = arith.constant 0 : index
    %c0_14 = arith.constant 0 : index
    %37 = vector.load %arg3[%c0_13, %c0_14] : memref<4x4xf32, #tpu.memory_space<vmem>>, vector<4x4xf32>
    %cst_15 = arith.constant dense<0.000000e+00> : vector<4x256xf32>
    %38 = tpu.matmul %37, %35, %cst_15 {dimension_numbers = #tpu.dot_dimension_numbers<[1], [0], [0], [1], [0, 0, 1, 1], [], []>} : vector<4x4xf32>, vector<4x256xf32>, vector<4x256xf32> -> vector<4x256xf32>
    %c0_16 = arith.constant 0 : index
    %c0_17 = arith.constant 0 : index
    %39 = vector.load %arg4[%c0_16, %c0_17] : memref<4x1xf32, #tpu.memory_space<vmem>>, vector<4x1xf32>
    %40 = vector.broadcast %39 : vector<4x1xf32> to vector<4x256xf32>
    %41 = arith.addf %38, %40 : vector<4x256xf32>
    %cst_18 = arith.constant 0.000000e+00 : f32
    %42 = vector.broadcast %cst_18 : f32 to vector<4x256xf32>
    %43 = arith.maximumf %41, %42 : vector<4x256xf32>
    %44 = vector.broadcast %cst_18 : f32 to vector<4x256xf32>
    %45 = arith.subf %41, %44 : vector<4x256xf32>
    %46 = arith.cmpf one, %45, %45 : vector<4x256xf32>
    %47 = vector.broadcast %cst_18 : f32 to vector<4x256xf32>
    %48 = arith.addf %41, %47 : vector<4x256xf32>
    %49 = math.absf %45 : vector<4x256xf32>
    %cst_19 = arith.constant 0.000000e+00 : f32
    %50 = vector.broadcast %cst_19 : f32 to vector<4x256xf32>
    %51 = arith.subf %50, %49 : vector<4x256xf32>
    %52 = math.exp %51 : vector<4x256xf32>
    %53 = math.log1p %52 : vector<4x256xf32>
    %54 = arith.addf %43, %53 : vector<4x256xf32>
    %55 = arith.select %46, %48, %54 : vector<4x256xi1>, vector<4x256xf32>
    %c0_20 = arith.constant 0 : index
    %c0_21 = arith.constant 0 : index
    %56 = vector.load %arg6[%c0_20, %c0_21] : memref<4x256xf32, #tpu.memory_space<vmem>>, vector<4x256xf32>
    tpu.vector_store %arg6[%c0_20, %c0_21], %55 {strides = array<i32>} : memref<4x256xf32, #tpu.memory_space<vmem>>, vector<4x256xf32>,
    return
  }
  func.func @transform_0(%arg0: i32) -> i32 {
    %c0_i32 = arith.constant 0 : i32
    %c0_i32_0 = arith.constant 0 : i32
    return %c0_i32 : i32
  }
  func.func @transform_1(%arg0: i32) -> (i32, i32) {
    %c0_i32 = arith.constant 0 : i32
    %c0_i32_0 = arith.constant 0 : i32
    return %c0_i32, %arg0 : i32, i32
  }
  func.func @transform_2(%arg0: i32) -> (i32, i32) {
    %c0_i32 = arith.constant 0 : i32
    %c0_i32_0 = arith.constant 0 : i32
    %c0_i32_1 = arith.constant 0 : i32
    return %c0_i32, %c0_i32_0 : i32, i32
  }
  func.func @transform_3(%arg0: i32) -> (i32, i32) {
    %c0_i32 = arith.constant 0 : i32
    %c0_i32_0 = arith.constant 0 : i32
    %c0_i32_1 = arith.constant 0 : i32
    return %c0_i32, %c0_i32_0 : i32, i32
  }
  func.func @transform_4(%arg0: i32) -> (i32, i32) {
    %c0_i32 = arith.constant 0 : i32
    %c0_i32_0 = arith.constant 0 : i32
    return %c0_i32, %arg0 : i32, i32
  }
  func.func @transform_5(%arg0: i32) -> (i32, i32) {
    %c0_i32 = arith.constant 0 : i32
    %c0_i32_0 = arith.constant 0 : i32
    return %c0_i32, %arg0 : i32, i32
  }
}

</mosaic_0001>

<bundles_post_ra>
// kernel: tpu_custom_call.1
= control target key start
LH: loop header
LB: loop body
LE: loop exit
PB: predicated region body
PF: predicated region fallthrough
CT: control target
= control target key end

     0   :  { %11 = vsyncpa [#allocation6], 0  ;;  %s1106_s0 = inlined_call_operand.vmem [shape: f32[3], index: 0, kind: input, shape index: {}]   ;;  %s1107_s1 = inlined_call_operand.hbm [shape: bf16[4,512], index: 1, kind: input, shape index: {}]   ;;  %s1108_s2 = inlined_call_operand.vmem [shape: f32[4,4], index: 2, kind: input, shape index: {}]   ;;  %s1109_s3 = inlined_call_operand.vmem [shape: f32[4,1], index: 3, kind: input, shape index: {}]   ;;  %s1110_s4 = inlined_call_operand.hbm [shape: f32[4,512], index: 4, kind: output, shape index: {0}]   ;;  %s1111_s5 = inlined_call_operand.hbm [shape: f32[4,512], index: 5, kind: output, shape index: {1}]  }
   0x1   :  { %12 = vsyncpa [#allocation4], 0 }
   0x2   :  { %14 = vsyncpa [#allocation4 + $0x1], 0 }
   0x3   :  { %15 = vsyncpa [#allocation5], 0 }
   0x4   :  { %17 = vsyncpa [#allocation5 + $0x1], 0 }
   0x5   :  { %18 = vsyncpa [#allocation10], 0 }
   0x6   :  { %20 = vsyncpa [#allocation10 + $0x1], 0  ;;  %s918_s18 = smov 0   ;;  %s920_s19 = smov 0  }
   0x7   :  { %s922_s20 = smov 0   ;;  %s924_s21 = smov 0  }
   0x8 LB: > { %s939_s22 = sadd.s32 4294967295, %s881_s21   ;;  %s630_s23 = sadd.s32 4294967294, %s881_s21   ;;  %s881_s21 = sphi %s924_s21, %s1123_s21   ;;  %s877_s20 = sphi %s922_s20, %s1122_s20   ;;  %s873_s19 = sphi %s920_s19, %s1121_s19   ;;  %s869_s18 = sphi %s918_s18, %s1120_s18  }
   0x9   : > { %p67_p0 = scmp.ne.s32.totalorder %s873_s19, %s869_s18  ;;  %p68_p1 = scmp.eq.s32.totalorder %s939_s22, 0 }
   0xa   : > { %p133_p2 = scmp.eq.s32.totalorder %s939_s22, 1  ;;  %p139_p3 = scmp.eq.s32.totalorder %s630_s23, 1 }
   0xb   : > { %p948_p4 = por %p68_p1, %p67_p0  ;;  %p631_p5 = scmp.ge.s32.totalorder %s881_s21, 1 }
   0xc   : > { %p953_p6 = por %p139_p3, %p67_p0  ;;  %p172_p7 = scmp.lt.s32.totalorder %s881_s21, 3 }
   0xd   : > { %s184_s28 = sshll.u32 %s1106_s0, 4  ;;  %s969_s30 = sadd.s32 1, %s881_s21   ;;  %s185_s28 = int_to_ptr.vmem [resolvable:$true] %s184_s28 }
   0xe   : > { %p961_p8 = pnand %p631_p5, %p172_p7  ;;  %s51_s6 = ssub.s32 %s881_s21, %s969_s30 }
   0xf   : > { %p52_p12 = scmp.eq.s32.totalorder %s51_s6, 0  ;;  %s54_s7 = sadd.s32 1, %s877_s20 }
  0x10   : > { %p669_p10 = pneg %p961_p8  ;;  %p61_p13 = scmp.ne.s32.totalorder %s877_s20, %s873_s19 }
  0x11   : > { %s883_s8 = smov [#allocation3]   ;;  %p62_p0 = scmp.eq.s32.totalorder %s881_s21, 0 }
  0x12   : > { %p670_p11 = pnand %p669_p10, %p68_p1  ;;  %p984_p3 = por %p133_p2, %p61_p13 }
  0x13   : > { %s979_s9 = scalar_select %p52_p12, %s877_s20, %s54_s7  }
  0x14   : > { %672 = dma.vmem_to_smem (!%p670_p11), %s185_s28, 16, %s883_s8, [#allocation6]  }
  0x15   : > { %s201_s11 = sand.u32 1, %s877_s20   ;;  %p63_p5 = por %p62_p0, %p61_p13 }
  0x16   : > { %p685_p7 = scmp.lt.s32.totalorder %s881_s21, 2  ;;  %s634_s12 = sshll.u32 %s201_s11, 2 }
  0x17   : > { %s656_s13 = sshll.u32 %s881_s21, 2  ;;  %s205_s23 = scalar_lea.vmem [#allocation7], %s634_s12 }
  0x18   : > { %s210_s16 = scalar_lea.hbm %s1107_s1, %s656_s13  ;;  %s214_s26 = sshll.u32 %s205_s23, 4  ;;  %s215_s26 = int_to_ptr.vmem [resolvable:$true] %s214_s26 }
  0x19   : > { %s212_s17 = sshll.u32 %s210_s16, 4  ;;  %p994_p10 = pnand %p685_p7, %p63_p5  ;;  %s213_s17 = int_to_ptr.hbm [resolvable:$true] %s212_s17 }
  0x1a   : > { %s202_s28 = scalar_lea.sflag [#allocation4], %s201_s11  ;;  %s749_s6 = sshra.s32 %s213_s17, 4  ;;  %s750_s6 = int_to_ptr.hbm [resolvable:$true] %s749_s6 }
  0x1b   : > { %s751_s7 = scalar_lea.hbm %s750_s6, 4  ;;  %p753_p11 = pneg %p994_p10 }
  0x1c   : > { %p752_p2 = scmp.ne.s32.totalorder %s750_s6, %s751_s7  ;;  %s756_s12 = scalar_lea.hbm %s1107_s1, 8 }
  0x1d   : > { %p757_p0 = scmp.lt.s32.totalorder %s750_s6, %s1107_s1  ;;  %p758_p5 = scmp.lt.s32.totalorder %s756_s12, %s751_s7 }
  0x1e   : > { %p754_p12 = pnand %p753_p11, %p752_p2 }
  0x1f   : > { %p759_p7 = por %p758_p5, %p757_p0 }
  0x20   : > { %p755_p13 = pneg %p754_p12 }
  0x22   : > { %p760_p9 = pnand %p759_p7, %p755_p13 }
  0x24   : > { %763 = shalt.err (!%p760_p9)
}
  0x25   : > { %676 = dma.hbm_to_vmem [thread:$0]  (!%p994_p10), %s213_s17, 64, %s215_s26, %s202_s28  }
  0x26   : > { %223 = sbr.rel (%p961_p8) target bundleno = 378 (0x17a), region = 36 }
  0x2b   : > { %852 = dma.done.wait (%p68_p1), [#allocation6], 16  }
  0x2c   : > { %854 = vsyncadd (%p68_p1), [#allocation6], 4294967280  ;;  %s1015_s11 = sand.u32 1, %s873_s19  }
  0x2d   : > { %s639_s16 = sshll.u32 %s1015_s11, 2  ;;  %s231_s23 = scalar_lea.sflag [#allocation4], %s1015_s11 }
  0x2e   : > { %s234_s6 = scalar_lea.vmem [#allocation7], %s639_s16 }
  0x2f   : > { %856 = dma.done.wait (%p948_p4), %s231_s23, 64  }
  0x30   : > { %858 = vsyncadd (%p948_p4), %s231_s23, 4294967232 }
  0x31   : > { %240 = sfence }
  0x32   : > { %v273_v0 = vld [vmem:[%s234_s6] sm:$0xf]  ;;  %v884_v1 = vmov 0   ;;  %s885_s29 = smov 1   ;;  %s886_s24 = smov 2   ;;  %v275_v23 = vlaneseq  ;;  %vm300_vm0 = vcmask 7168  }
  0x33   : > { %272 = vst [vmem:[#allocation2] sm:$0x3] %v884_v1  ;;  %725 = vset.pattern.permute.xlu0 %v884_v1  ;;  %s887_s17 = smov 3   ;;  %v382_v22 = vld [vmem:[%s1109_s3] sm:$0xf]  ;;  %s1026_s28 = sld [smem:[#allocation3]] }
  0x34   : > { %274 = vst [vmem:[#allocation2 + $0x2] sm:$0xf] %v273_v0  ;;  %s1028_s7 = sld [smem:[#allocation3 + $0x1]]  ;;  %vm330_vm1 = vcmask 15360   ;;  %v276_v25 = vand.u32 127, %v275_v23  ;;  %vm362_vm4 = vcmask 23552  }
  0x35   : > { %s1030_s8 = sld [smem:[#allocation3 + $0x2]]  ;;  %vm377_vm8 = vcmask 1043456   ;;  %v381_v50 = vld [vmem:[%s1108_s2] sm:$0xf]  ;;  %vm388_vm9 = vcmask 31744   ;;  %s1112_s14 = sshll.u32 %s1015_s11, 3 }
  0x36   : > { %vm284_vm2 = vcmp.ge.s32.totalorder %v276_v25, 1  ;;  %vm314_vm3 = vcmp.ge.s32.totalorder %v276_v25, 2  ;;  %v277_v30 = vadd.s32 128, %v276_v25  ;;  %vm346_vm5 = vcmp.ge.s32.totalorder %v276_v25, 3  ;;  %s260_s15 = scalar_lea.vmem [#allocation8], %s1112_s14  ;;  %s657_s16 = sshll.u32 %s939_s22, 3 }
  0x37   : > { %s479_s26 = scalar_lea.sflag [#allocation5], %s1015_s11  ;;  %s799_s13 = scalar_lea.hbm %s1110_s4, 16 }
  0x38   : > { %v279_v37 = vand.u32 127, %v277_v30 }
  0x39   : > { %v307_v31 = vstv %s1026_s28 }
  0x3a   : > { %v337_v33 = vstv %s1028_s7  ;;  %vm315_vm6 = vcmp.ge.s32.totalorder %v279_v37, 2  ;;  %vm285_vm7 = vcmp.ge.s32.totalorder %v279_v37, 1  ;;  %vm347_vm10 = vcmp.ge.s32.totalorder %v279_v37, 3 }
  0x3b   : > { %v280_v2 = vld [vmem:[#allocation2] sm:$0x3f]  ;;  %v369_v41 = vstv %s1030_s8 }
  0x3c   : > { %v281_v3 = vunpack.c.l.bf16 %v280_v2  ;;  %v282_v4 = vunpack.c.h.bf16 %v280_v2  ;;  %v310_v5 = vld [vmem:[#allocation2] sm:$0x3f] }
  0x3d   : > { %v311_v6 = vunpack.c.l.bf16 %v310_v5  ;;  %v312_v7 = vunpack.c.h.bf16 %v310_v5  ;;  %v342_v11 = vld [vmem:[#allocation2] sm:$0x3f] }
  0x3e   : > { %288 = vst [vmem:[#allocation1] ss:$2 sm:$0xff] %v281_v3  ;;  %v343_v12 = vunpack.c.l.bf16 %v342_v11  ;;  %v344_v13 = vunpack.c.h.bf16 %v342_v11 }
  0x3f   : > { %290 = vst [vmem:[#allocation1 + $0x10] ss:$2 sm:$0xff] %v282_v4 }
  0x45   : > { %v292_v8 = vld.sshfl [vmem:[#allocation1 + $0x8] sm:$0xff pattern:$0x75316420]  ;;  %v291_v9 = vld.sshfl [vmem:[#allocation1] sm:$0xff pattern:$0x75316420] }
  0x46   : > { %296 = vrot.lane.b32.xlu0 %v292_v8, %s885_s29  ;;  %318 = vst [vmem:[#allocation1] ss:$2 sm:$0xff] %v311_v6  ;;  %v293_v10 = vld.sshfl [vmem:[#allocation1 + $0x10] sm:$0xff pattern:$0x75316420]  ;;  %294 = vrot.lane.b32.xlu2 %v291_v9, %s885_s29 }
  0x47   : > { %320 = vst [vmem:[#allocation1 + $0x10] ss:$2 sm:$0xff] %v312_v7 }
  0x4d   : > { %v322_v14 = vld.sshfl [vmem:[#allocation1 + $0x8] sm:$0xff pattern:$0x75316420]  ;;  %v321_v15 = vld.sshfl [vmem:[#allocation1] sm:$0xff pattern:$0x75316420] }
  0x4e   : > { %298 = vrot.lane.b32.xlu0 %v293_v10, %s885_s29  ;;  %326 = vrot.lane.b32.xlu1 %v322_v14, %s886_s24  ;;  %350 = vst [vmem:[#allocation1] ss:$2 sm:$0xff] %v343_v12  ;;  %v323_v16 = vld.sshfl [vmem:[#allocation1 + $0x10] sm:$0xff pattern:$0x75316420]  ;;  %s495_s29 = scalar_lea.hbm %s1110_s4, %s657_s16 }
  0x4f   : > { %352 = vst [vmem:[#allocation1 + $0x10] ss:$2 sm:$0xff] %v344_v13  ;;  %324 = vrot.lane.b32.xlu2 %v321_v15, %s886_s24 }
  0x55   : > { %v354_v17 = vld.sshfl [vmem:[#allocation1 + $0x8] sm:$0xff pattern:$0x75316420]  ;;  %v353_v18 = vld.sshfl [vmem:[#allocation1] sm:$0xff pattern:$0x75316420] }
  0x56   : > { %328 = vrot.lane.b32.xlu1 %v323_v16, %s886_s24  ;;  %358 = vrot.lane.b32.xlu0 %v354_v17, %s887_s17  ;;  %v355_v19 = vld.sshfl [vmem:[#allocation1 + $0x10] sm:$0xff pattern:$0x75316420]  ;;  %s497_s24 = sshll.u32 %s260_s15, 4  ;;  %s498_s24 = int_to_ptr.vmem [resolvable:$true] %s497_s24 }
  0x57   : > { %356 = vrot.lane.b32.xlu2 %v353_v18, %s887_s17 }
  0x5e   : > { %360 = vrot.lane.b32.xlu1 %v355_v19, %s887_s17  ;;  %385 = vperm.xlu0 %725, %v382_v22   ;;  %s499_s17 = sshll.u32 %s495_s29, 4  ;;  %s500_s17 = int_to_ptr.hbm [resolvable:$true] %s499_s17 }
  0x5f   : > { %s793_s27 = sshra.s32 %s500_s17, 4  ;;  %s794_s27 = int_to_ptr.hbm [resolvable:$true] %s793_s27 }
  0x60   : > { %s795_s28 = scalar_lea.hbm %s794_s27, 8  ;;  %p800_p9 = scmp.lt.s32.totalorder %s794_s27, %s1110_s4 }
  0x61   : > { %p796_p1 = scmp.ne.s32.totalorder %s794_s27, %s795_s28  ;;  %p801_p10 = scmp.lt.s32.totalorder %s799_s13, %s795_s28 }
  0x63   : > { %p797_p4 = pnand %p796_p1, %p984_p3  ;;  %p802_p2 = por %p801_p10, %p800_p9 }
  0x65   : > { %p798_p8 = pneg %p797_p4 }
  0x67   : > { %p803_p11 = pnand %p802_p2, %p798_p8 }
  0xa0   : > { %v295_v20 = vpop.permute.xlu2 %294 }
  0xa9   : > { %v325_v24 = vpop.permute.xlu2 %324 }
  0xb1   : > { %v357_v35 = vpop.permute.xlu2 %356 }
  0xb8   : > { %v297_v21 = vpop.permute.xlu0 %296 }
  0xb9   : > { %v301_v28 = vsel %vm300_vm0, %v295_v20, %v297_v21 }
  0xba   : > { %v305_v32 = vsel %vm284_vm2, %v301_v28, 0.0 }
  0xbb   : > { %v308_v36 = vmul.f32 %v307_v31, %v305_v32 }
  0xc0   : > { %v299_v26 = vpop.permute.xlu0 %298  ;;  %v327_v27 = vpop.permute.xlu1 %326 }
  0xc1   : > { %v331_v29 = vsel %vm330_vm1, %v325_v24, %v327_v27  ;;  %v302_v45 = vsel %vm300_vm0, %v297_v21, %v299_v26 }
  0xc2   : > { %v335_v34 = vsel %vm314_vm3, %v331_v29, 0.0  ;;  %v306_v51 = vsel %vm285_vm7, %v302_v45, 0.0 }
  0xc3   : > { %v338_v38 = vmul.f32 %v337_v33, %v335_v34  ;;  %v309_v54 = vmul.f32 %v307_v31, %v306_v51 }
  0xc5   : > { %v340_v46 = vadd.f32 %v338_v38, %v308_v36 }
  0xc8   : > { %v329_v39 = vpop.permute.xlu1 %328  ;;  %v359_v40 = vpop.permute.xlu0 %358 }
  0xc9   : > { %v332_v42 = vsel %vm330_vm1, %v327_v27, %v329_v39  ;;  %v363_v43 = vsel %vm362_vm4, %v357_v35, %v359_v40 }
  0xca   : > { %v367_v44 = vsel %vm346_vm5, %v363_v43, 0.0  ;;  %v336_v48 = vsel %vm315_vm6, %v332_v42, 0.0 }
  0xcb   : > { %v370_v47 = vmul.f32 %v369_v41, %v367_v44  ;;  %v339_v52 = vmul.f32 %v337_v33, %v336_v48 }
  0xcd   : > { %v372_v49 = vadd.f32 %v370_v47, %v340_v46  ;;  %v341_v57 = vadd.f32 %v339_v52, %v309_v54 }
  0xcf   : > { %644 = vmatpush.msk.msra.mxu0 %vm377_vm8, %v372_v49 }
  0xd0   : > { %v361_v53 = vpop.permute.xlu1 %360  ;;  %645 = vmatmul.msk.f32.vlgmr.msra.gmra.mxu0 %vm388_vm9, %v381_v50 }
  0xd1   : > { %v364_v55 = vsel %vm362_vm4, %v359_v40, %v361_v53 }
  0xd2   : > { %v368_v56 = vsel %vm347_vm10, %v364_v55, 0.0 }
  0xd3   : > { %v371_v58 = vmul.f32 %v369_v41, %v368_v56 }
  0xd5   : > { %v373_v59 = vadd.f32 %v371_v58, %v341_v57 }
  0xd7   : > { %v376_v60 = vrot.slane %v373_v59, 4  ;;  %646 = vmatpush.msk.msra.mxu1 %vm377_vm8, %v373_v59 }
  0xd8   : > { %647 = vmatmul.msk.f32.vlgmr.msra.gmra.mxu1 %vm388_vm9, %v381_v50 }
  0xd9   : > { %v378_v61 = vsel %vm377_vm8, %v372_v49, %v376_v60 }
  0xda   : > { %380 = vst [vmem:[%s260_s15] sm:$0xff] %v378_v61 }
  0xdb   : > { %806 = shalt.err (!%p803_p11)
}
  0xdc   : > { %665 = dma.vmem_to_hbm [thread:$0]  (%p984_p3), %s498_s24, 128, %s500_s17, %s479_s26   ;;  %v386_v62 = vpop.permute.xlu0 %385 }
  0xdd   : > { %s510_s23 = scalar_lea.hbm %s1111_s5, %s657_s16  ;;  %s1118_s6 = sshll.u32 %s1015_s11, 3 }
  0xde   : > { %s267_s29 = scalar_lea.vmem [#allocation9], %s1118_s6  ;;  %s514_s17 = sshll.u32 %s510_s23, 4  ;;  %s515_s17 = int_to_ptr.hbm [resolvable:$true] %s514_s17 }
  0xdf   : > { %s512_s24 = sshll.u32 %s267_s29, 4  ;;  %s484_s22 = scalar_lea.sflag [#allocation10], %s1015_s11  ;;  %s513_s24 = int_to_ptr.vmem [resolvable:$true] %s512_s24 }
  0xe0   : > { %s821_s16 = sshra.s32 %s515_s17, 4  ;;  %s827_s7 = scalar_lea.hbm %s1111_s5, 16  ;;  %s822_s16 = int_to_ptr.hbm [resolvable:$true] %s821_s16 }
  0xe1   : > { %s823_s26 = scalar_lea.hbm %s822_s16, 8  ;;  %p828_p5 = scmp.lt.s32.totalorder %s822_s16, %s1111_s5 }
  0xe2   : > { %p824_p12 = scmp.ne.s32.totalorder %s822_s16, %s823_s26  ;;  %p829_p7 = scmp.lt.s32.totalorder %s827_s7, %s823_s26 }
  0xe4   : > { %p825_p13 = pnand %p824_p12, %p984_p3  ;;  %p830_p1 = por %p829_p7, %p828_p5 }
  0xe6   : > { %p826_p0 = pneg %p825_p13 }
  0xe8   : > { %p831_p4 = pnand %p830_p1, %p826_p0 }
 0x14d   : > { %v413_v63 = vpop.f32.mrf.mxu0 }
 0x14e   : > { %v414_v0 = vadd.f32 %v413_v63, %v386_v62 }
 0x150   : > { %v442_v1 = vand.u32 2147483647, %v414_v0  ;;  %v436_v26 = vmax.f32 %v414_v0, 0.0  ;;  %vm438_vm14 = vcmp.ne.f32.partialorder %v414_v0, %v414_v0 }
 0x152   : > { %v444_v2 = vsub.f32 0.0, %v442_v1 }
 0x154   : > { %v446_v3 = vmul.f32 1.442695, %v444_v2 }
 0x155   : > { %v433_v4 = vpop.f32.mrf.mxu1 }
 0x156   : > { %726 = vpow2.f32 %v446_v3  ;;  %v434_v5 = vadd.f32 %v433_v4, %v386_v62 }
 0x158   : > { %v443_v6 = vand.u32 2147483647, %v434_v5  ;;  %v437_v27 = vmax.f32 %v434_v5, 0.0  ;;  %vm439_vm13 = vcmp.ne.f32.partialorder %v434_v5, %v434_v5 }
 0x15a   : > { %v445_v7 = vsub.f32 0.0, %v443_v6 }
 0x15c   : > { %v727_v8 = vpop.eup %726  ;;  %v448_v9 = vmul.f32 1.442695, %v445_v7 }
 0x15d   : > { %v450_v10 = vadd.f32 1.0, %v727_v8  ;;  %v453_v11 = vmul.f32 -0.5, %v727_v8  ;;  %v456_v17 = vand.u32 2147483647, %v727_v8 }
 0x15e   : > { %728 = vpow2.f32 %v448_v9 }
 0x15f   : > { %730 = vlog2.f32 %v450_v10  ;;  %v454_v14 = vadd.f32 1.0, %v453_v11  ;;  %vm457_vm11 = vcmp.lt.f32.partialorder %v456_v17, 0.0004427343 }
 0x161   : > { %v455_v19 = vmul.f32 %v727_v8, %v454_v14 }
 0x164   : > { %v729_v12 = vpop.eup %728 }
 0x165   : > { %v459_v13 = vadd.f32 1.0, %v729_v12  ;;  %v462_v15 = vmul.f32 -0.5, %v729_v12  ;;  %v731_v16 = vpop.eup %730  ;;  %v465_v21 = vand.u32 2147483647, %v729_v12 }
 0x166   : > { %v452_v18 = vmul.f32 0.6931472, %v731_v16 }
 0x167   : > { %732 = vlog2.f32 %v459_v13  ;;  %v463_v20 = vadd.f32 1.0, %v462_v15  ;;  %vm466_vm12 = vcmp.lt.f32.partialorder %v465_v21, 0.0004427343 }
 0x168   : > { %v458_v23 = vsel %vm457_vm11, %v455_v19, %v452_v18 }
 0x169   : > { %v464_v25 = vmul.f32 %v729_v12, %v463_v20  ;;  %v468_v29 = vadd.f32 %v458_v23, %v436_v26 }
 0x16b   : > { %v470_v33 = vsel %vm438_vm14, %v414_v0, %v468_v29 }
 0x16d   : > { %v733_v22 = vpop.eup %732 }
 0x16e   : > { %v461_v24 = vmul.f32 0.6931472, %v733_v22 }
 0x170   : > { %v467_v28 = vsel %vm466_vm12, %v464_v25, %v461_v24 }
 0x171   : > { %v469_v30 = vadd.f32 %v467_v28, %v437_v27 }
 0x173   : > { %v471_v31 = vsel %vm439_vm13, %v434_v5, %v469_v30 }
 0x174   : > { %v474_v32 = vrot.slane %v471_v31, 4 }
 0x176   : > { %v475_v34 = vsel %vm377_vm8, %v470_v33, %v474_v32 }
 0x177   : > { %477 = vst [vmem:[%s267_s29] sm:$0xff] %v475_v34 }
 0x178   : > { %834 = shalt.err (!%p831_p4)
}
 0x179   : > { %666 = dma.vmem_to_hbm [thread:$0]  (%p984_p3), %s513_s24, 128, %s515_s17, %s484_s22  }
 0x17a PF: > { %s526_s11 = sand.u32 1, %s869_s18   ;;  %p1119_p8 = scmp.ge.s32.totalorder %s881_s21, 2 }
 0x17b   : > { %s527_s12 = scalar_lea.sflag [#allocation5], %s526_s11 }
 0x17c   : > { %p678_p9 = pnand %p1119_p8, %p953_p6 }
 0x17e   : > { %p679_p10 = pneg %p678_p9 }
 0x180   : > { %860 = dma.done.wait (%p679_p10), %s527_s12, 128  }
 0x181   : > { %862 = vsyncadd (%p679_p10), %s527_s12, 4294967168  ;;  %s537_s14 = scalar_lea.sflag [#allocation10], %s526_s11 }
 0x182   : > { %864 = dma.done.wait (%p679_p10), %s537_s14, 128  }
 0x183   : > { %866 = vsyncadd (%p679_p10), %s537_s14, 4294967168  ;;  %p23_p3 = scmp.ge.s32.totalorder %s969_s30, 4   ;;  %s1120_s18 = smov %s873_s19 }
 0x184   : > { %s1121_s19 = smov %s877_s20  ;;  %s1122_s20 = smov %s979_s9 }
 0x185   : > { %s1123_s21 = smov %s969_s30  ;;  %25 = sbr.rel (!%p23_p3) target bundleno = 8 (0x8), region = 106 }
 0x18a   :  { %543 = vsyncpa [#allocation4], 1 }
 0x18b   :  { %545 = vsyncpa [#allocation4 + $0x1], 1 }
 0x18c   :  { %546 = vsyncpa [#allocation5], 1 }
 0x18d   :  { %548 = vsyncpa [#allocation5 + $0x1], 1 }
 0x18e   :  { %549 = vsyncpa [#allocation10], 1 }
 0x18f   :  { %551 = vsyncpa [#allocation10 + $0x1], 1 }
 0x190   :  { %552 = vsyncpa [#allocation6], 1 }
 0x191   :  { %554 = vsyncpa [#allocation6 + $0x1], 1 }

</bundles_post_ra>
